<compile_context>
chip_gen: v7x
topology: tpu7x:2x2x1
jax: 0.10.0
libtpu: 0.0.40
codegen_flags: <defaults>
</compile_context>

<pallas_src>
import jax
import jax.numpy as jnp
from jax.experimental import pallas as pl
from jax.experimental.pallas import tpu as pltpu


_LANE_CHOICES = (1024, 512, 256, 128)      # widest lane-dense last dim that divides numel
_TARGET_BLOCK_ELEMS = 256 * 1024           # ~1 MiB per f32 block
_MAX_TM = 2048                             # cap on rows-per-block


# ----------------------------------------------------------------------------
# Kernel factory: constants are baked in as Python floats (fixed per filter).
# ----------------------------------------------------------------------------
def _make_kernel(d0, d1, d2, hp, cp, hn, cn):
    d0, d1, d2 = float(d0), float(d1), float(d2)
    hp, cp, hn, cn = float(hp), float(cp), float(hn), float(cn)

    def kernel(x_ref, o_ref):
        # Cast (possibly bf16) input to f32 inside the kernel.
        x = x_ref[...].astype(jnp.float32)
        # sigmoid(a) = 0.5*tanh(a/2) + 0.5 ; the 0.5s and 1/norm_scale are folded
        # into d0/d1/d2/hp/hn, so each activation is a single EUP tanh.
        tp = jnp.tanh(hp * (x - cp))
        tn = jnp.tanh(hn * (x - cn))
        o_ref[...] = (d0 + d1 * tp + d2 * tn).astype(o_ref.dtype)

    return kernel


# ----------------------------------------------------------------------------
# Forward wrapper (built once per filter instance; jit-cached per input shape).
# ----------------------------------------------------------------------------
def _build_forward(kernel):
    @jax.jit
    def forward(x):
        orig_shape = x.shape
        n = x.size
        if n == 0:
            return jnp.zeros(orig_shape, jnp.float32)

        # Feed f32 / bf16 straight through (kernel casts); other dtypes fall back
        # to an f32 cast in the wrapper.
        if x.dtype not in (jnp.float32, jnp.bfloat16):
            x = x.astype(jnp.float32)

        x_flat = x.reshape(-1)

        # Pick the widest lane dim that divides numel -> no pad / slice copies.
        lanes = None
        for w in _LANE_CHOICES:
            if n % w == 0:
                lanes = w
                break
        if lanes is None:
            # Ragged fallback: minimal pad to a multiple of 128 lanes.
            lanes = 128
            pad = (-n) % lanes
            x_flat = jnp.pad(x_flat, (0, pad))
        padded_n = x_flat.size
        rows = padded_n // lanes

        # ~1 MiB f32 block; tm multiple of 16 (safe for bf16 sublane packing).
        tm = min(_MAX_TM, max(16, (_TARGET_BLOCK_ELEMS // lanes // 16) * 16))
        if rows <= tm:
            # Single block equal to the full array (always a legal block shape).
            tm = rows
        grid = (pl.cdiv(rows, tm),)   # overhanging last block: OOB writes masked

        out2d = pl.pallas_call(
            kernel,
            out_shape=jax.ShapeDtypeStruct((rows, lanes), jnp.float32),
            grid=grid,
            in_specs=[pl.BlockSpec((tm, lanes), lambda i: (i, 0))],
            out_specs=pl.BlockSpec((tm, lanes), lambda i: (i, 0)),
            compiler_params=pltpu.CompilerParams(
                dimension_semantics=("parallel",),
            ),
        )(x_flat.reshape(rows, lanes))

        out_flat = out2d.reshape(-1)
        if padded_n != n:
            out_flat = out_flat[:n]
        return out_flat.reshape(orig_shape)

    return forward


# ----------------------------------------------------------------------------
# Module-equivalent wrapper.
# ----------------------------------------------------------------------------
class FlexibleFilterPallas:
    def __init__(
        self,
        baseline: float = 0.1,
        positive_scale: float = 1.0,
        negative_scale: float = 1.0,
        positive_center: float = 0.75,
        negative_center: float = -0.75,
        positive_steepness: float = 5.0,
        negative_steepness: float = 5.0,
    ):
        self.baseline = float(baseline)
        self.positive_scale = float(positive_scale)
        self.negative_scale = float(negative_scale)
        self.positive_center = float(positive_center)
        self.negative_center = float(negative_center)
        self.positive_steepness = float(positive_steepness)
        self.negative_steepness = float(negative_steepness)

        # norm_scale = max(|transfer_function(linspace(-1, 1, 101))|)  (init-time)
        xs = jnp.linspace(-1.0, 1.0, 101, dtype=jnp.float32)
        pos = jax.nn.sigmoid(self.positive_steepness * (xs - self.positive_center))
        neg = 1.0 - jax.nn.sigmoid(self.negative_steepness * (xs - self.negative_center))
        y = self.baseline + self.positive_scale * pos + self.negative_scale * neg
        self.norm_scale = float(jnp.max(jnp.abs(y)))

        # Fold constants:
        #   y/norm = c0 + c1*sig_p + c2*sig_n,  c0=(base+neg)/norm, c1=pos/norm, c2=-neg/norm
        # and sigmoid(a) = 0.5*tanh(a/2)+0.5:
        #   y/norm = d0 + d1*tanh(hp*(x-cp)) + d2*tanh(hn*(x-cn))
        inv = 1.0 / self.norm_scale
        c0 = (self.baseline + self.negative_scale) * inv
        c1 = self.positive_scale * inv
        c2 = -self.negative_scale * inv
        d0 = c0 + 0.5 * (c1 + c2)
        d1 = 0.5 * c1
        d2 = 0.5 * c2
        hp = 0.5 * self.positive_steepness
        hn = 0.5 * self.negative_steepness

        self._kernel = _make_kernel(d0, d1, d2, hp, self.positive_center,
                                    hn, self.negative_center)
        self._forward = _build_forward(self._kernel)

    def __call__(self, x: jax.Array) -> jax.Array:
        return self._forward(x)


# ----------------------------------------------------------------------------
# Pure-JAX reference for verification.
# ----------------------------------------------------------------------------
def _reference(filt: FlexibleFilterPallas, x: jax.Array) -> jax.Array:
    x = x.astype(jnp.float32)
    pos = jax.nn.sigmoid(filt.positive_steepness * (x - filt.positive_center))
    neg = 1.0 - jax.nn.sigmoid(filt.negative_steepness * (x - filt.negative_center))
    y = filt.baseline + filt.positive_scale * pos + filt.negative_scale * neg
    return y / filt.norm_scale


if __name__ == "__main__":
    key = jax.random.PRNGKey(0)
    k0, k1, k2 = jax.random.split(key, 3)
    filt = FlexibleFilterPallas()

    # Main case: small NCHW-like float32 tensor (lane-dense fast path, no pad).
    x = jax.random.uniform(k0, (2, 4, 16, 16), dtype=jnp.float32, minval=-1.0, maxval=1.0)
    out = jax.block_until_ready(filt(x))
    ref = _reference(filt, x)
    assert out.shape == x.shape, (out.shape, x.shape)
    assert out.dtype == jnp.float32
    assert jnp.allclose(out, ref, atol=1e-5, rtol=1e-5), float(jnp.max(jnp.abs(out - ref)))

    # Ragged case (numel not a multiple of 128) exercises the minimal-pad fallback.
    x_ragged = jax.random.uniform(k1, (3, 5, 7), dtype=jnp.float32, minval=-1.5, maxval=1.5)
    out_r = jax.block_until_ready(filt(x_ragged))
    assert out_r.shape == x_ragged.shape
    assert jnp.allclose(out_r, _reference(filt, x_ragged), atol=1e-5, rtol=1e-5)

    # bf16 input: fed through untouched, cast happens inside the kernel; output f32.
    x_bf16 = jax.random.uniform(k2, (64, 256), dtype=jnp.float32,
                                minval=-1.0, maxval=1.0).astype(jnp.bfloat16)
    out_b = jax.block_until_ready(filt(x_bf16))
    assert out_b.dtype == jnp.float32
    assert jnp.allclose(out_b, _reference(filt, x_bf16), atol=1e-5, rtol=1e-5)

    print("KERNEL_OK")
</pallas_src>

<mosaic_0001>
module attributes {stable_mosaic.version = 11 : i64} {
  func.func @kernel(%arg0: i32, %arg1: memref<2x1024xf32, #tpu.memory_space<vmem>>, %arg2: memref<2x1024xf32, #tpu.memory_space<vmem>>) attributes {dimension_semantics = [#tpu.dimension_semantics<parallel>], iteration_bounds = array<i64: 1>, scalar_prefetch = 0 : i64, scratch_operands = 0 : i64, tpu.core_type = #tpu.core_type<tc>, window_params = [{transform_indices = @transform_0, window_bounds = array<i64: 2, 1024>}, {transform_indices = @transform_1, window_bounds = array<i64: 2, 1024>}]} {
    %c0 = arith.constant 0 : index
    %c0_0 = arith.constant 0 : index
    %0 = vector.load %arg1[%c0, %c0_0] : memref<2x1024xf32, #tpu.memory_space<vmem>>, vector<2x1024xf32>
    %cst = arith.constant 7.500000e-01 : f32
    %1 = vector.broadcast %cst : f32 to vector<2x1024xf32>
    %2 = arith.subf %0, %1 : vector<2x1024xf32>
    %cst_1 = arith.constant 2.500000e+00 : f32
    %3 = vector.broadcast %cst_1 : f32 to vector<2x1024xf32>
    %4 = arith.mulf %3, %2 : vector<2x1024xf32>
    %5 = math.tanh %4 : vector<2x1024xf32>
    %cst_2 = arith.constant -7.500000e-01 : f32
    %6 = vector.broadcast %cst_2 : f32 to vector<2x1024xf32>
    %7 = arith.subf %0, %6 : vector<2x1024xf32>
    %cst_3 = arith.constant 2.500000e+00 : f32
    %8 = vector.broadcast %cst_3 : f32 to vector<2x1024xf32>
    %9 = arith.mulf %8, %7 : vector<2x1024xf32>
    %10 = math.tanh %9 : vector<2x1024xf32>
    %cst_4 = arith.constant 0.569827616 : f32
    %11 = vector.broadcast %cst_4 : f32 to vector<2x1024xf32>
    %12 = arith.mulf %11, %5 : vector<2x1024xf32>
    %cst_5 = arith.constant 1.25362074 : f32
    %13 = vector.broadcast %cst_5 : f32 to vector<2x1024xf32>
    %14 = arith.addf %13, %12 : vector<2x1024xf32>
    %cst_6 = arith.constant -0.569827616 : f32
    %15 = vector.broadcast %cst_6 : f32 to vector<2x1024xf32>
    %16 = arith.mulf %15, %10 : vector<2x1024xf32>
    %17 = arith.addf %14, %16 : vector<2x1024xf32>
    %c0_7 = arith.constant 0 : index
    %c0_8 = arith.constant 0 : index
    %18 = vector.load %arg2[%c0_7, %c0_8] : memref<2x1024xf32, #tpu.memory_space<vmem>>, vector<2x1024xf32>
    tpu.vector_store %arg2[%c0_7, %c0_8], %17 {strides = array<i32>} : memref<2x1024xf32, #tpu.memory_space<vmem>>, vector<2x1024xf32>,
    return
  }
  func.func @transform_0(%arg0: i32) -> (i32, i32) {
    %c0_i32 = arith.constant 0 : i32
    %c0_i32_0 = arith.constant 0 : i32
    return %arg0, %c0_i32 : i32, i32
  }
  func.func @transform_1(%arg0: i32) -> (i32, i32) {
    %c0_i32 = arith.constant 0 : i32
    %c0_i32_0 = arith.constant 0 : i32
    return %arg0, %c0_i32 : i32, i32
  }
}

</mosaic_0001>

<bundles_post_ra>
// kernel: forward.1
= control target key start
LH: loop header
LB: loop body
LE: loop exit
PB: predicated region body
PF: predicated region fallthrough
CT: control target
= control target key end

     0   :  { %s70_s0 = inlined_call_operand.vmem [shape: f32[2,1024], index: 0, kind: input, shape index: {}]   ;;  %s71_s1 = inlined_call_operand.vmem [shape: f32[2,1024], index: 1, kind: output, shape index: {}]  }
   0x1   :  { %v8_v0 = vld [vmem:[%s70_s0] sm:$0xff]  ;;  %v9_v1 = vld [vmem:[%s70_s0 + $0x8] sm:$0xff] }
   0x2   :  { %v36_v2 = vadd.f32 -0.75, %v8_v0  ;;  %v38_v3 = vadd.f32 0.75, %v8_v0  ;;  %v37_v4 = vadd.f32 -0.75, %v9_v1  ;;  %v39_v5 = vadd.f32 0.75, %v9_v1 }
   0x4   :  { %v12_v6 = vmul.f32 2.5, %v36_v2  ;;  %v18_v7 = vmul.f32 2.5, %v38_v3  ;;  %v13_v8 = vmul.f32 2.5, %v37_v4  ;;  %v19_v9 = vmul.f32 2.5, %v39_v5 }
   0x6   :  { %40 = vtanh.f32 %v12_v6 }
   0x7   :  { %42 = vtanh.f32 %v18_v7 }
   0x8   :  { %44 = vtanh.f32 %v13_v8 }
   0x9   :  { %46 = vtanh.f32 %v19_v9 }
  0x10   :  { %v41_v10 = vpop.eup %40 }
  0x11   :  { %v43_v11 = vpop.eup %42  ;;  %v22_v12 = vmul.f32 0.5698276, %v41_v10 }
  0x12   :  { %v45_v13 = vpop.eup %44  ;;  %v26_v14 = vmul.f32 -0.5698276, %v43_v11 }
  0x13   :  { %v47_v15 = vpop.eup %46  ;;  %v24_v16 = vadd.f32 1.2536207, %v22_v12  ;;  %v23_v17 = vmul.f32 0.5698276, %v45_v13 }
  0x14   :  { %v27_v18 = vmul.f32 -0.5698276, %v47_v15 }
  0x15   :  { %v28_v19 = vadd.f32 %v26_v14, %v24_v16  ;;  %v25_v20 = vadd.f32 1.2536207, %v23_v17 }
  0x17   :  { %30 = vst [vmem:[%s71_s1] sm:$0xff] %v28_v19  ;;  %v29_v21 = vadd.f32 %v27_v18, %v25_v20 }
  0x19   :  { %31 = vst [vmem:[%s71_s1 + $0x8] sm:$0xff] %v29_v21 }

</bundles_post_ra>
